<compile_context>
chip_gen: v7x
topology: tpu7x:2x2x1
jax: 0.10.0
libtpu: 0.0.40
codegen_flags: <defaults>
</compile_context>

<pallas_src>
import jax
import jax.numpy as jnp
from jax.experimental import pallas as pl
from jax.experimental.pallas import tpu as pltpu


def _offlearning_loss_kernel(bins_ref, scal_ref, fec_ref, pkt_ref, out_ref):
    B = scal_ref.shape[1]
    num_bounds = bins_ref.shape[0]

    # ---------------- bitrate loss ----------------
    pred = scal_ref[0:1, :]            # (1, B)
    gcc = scal_ref[1:2, :]             # (1, B)
    dg = scal_ref[2:3, :]              # (1, B)
    diff = pred - gcc
    pos = jnp.maximum(diff, 0.0)
    neg = jnp.maximum(-diff, 0.0)
    bitrate_terms = pos * pos * dg + neg * neg * (1.0 - dg)
    bitrate_loss = jnp.sum(bitrate_terms) * (1.0 / float(B))

    # ---------------- fec loss ----------------
    fs = pkt_ref[0]                    # (B, N) f32 frame sizes
    lc = pkt_ref[1]                    # (B, N) f32 loss counts
    mask_f = pkt_ref[2]                # (B, N) f32 {0, 1} mask (loss_flags != 0)

    fs_safe = jnp.where(mask_f > 0.0, fs, 1.0)   # guard unmasked entries
    alr = lc / fs_safe                            # actual loss rate

    # Fused bucketize(right=True) + per-batch gather as one select chain.
    # fec_bins is sorted ascending, so the last satisfied boundary k selects col k+1.
    pf = jnp.broadcast_to(fec_ref[:, 0:1], fs.shape)
    for k in range(num_bounds):                   # static, small unroll
        bound = bins_ref[k]                       # SMEM scalar -> free splat
        pf = jnp.where(fs >= bound, fec_ref[:, k + 1:k + 2], pf)

    d = alr - pf
    per_elem = jnp.where(d > 0.0, 3.0 * d, -d) * mask_f

    # One stacked lane-reduce produces both fec_sum and the masked count.
    stacked = jnp.concatenate([per_elem, mask_f], axis=0)     # (2B, N)
    row_sums = jnp.sum(stacked, axis=1, keepdims=True)        # (2B, 1)
    fec_sum = jnp.sum(row_sums[:B, :])
    count = jnp.sum(row_sums[B:, :])
    fec_loss = fec_sum / jnp.maximum(count, 1.0)

    out_ref[0, 0] = bitrate_loss + fec_loss


def offlearning_loss(pred_bitrate, gcc_bitrate, fec_table, frame_samples,
                     loss_flags, loss_counts, delay_gradient, fec_bins):
    B, N = frame_samples.shape
    num_bounds = fec_bins.shape[0]
    assert fec_table.shape[1] == num_bounds + 1, (
        "fec_table must have fec_bins.shape[0] + 1 columns")

    # Host-side packing / dtype conversion (keeps per-element converts out of kernel).
    batch_scalars = jnp.stack([pred_bitrate, gcc_bitrate, delay_gradient]
                              ).astype(jnp.float32)                       # (3, B)
    packets = jnp.stack([frame_samples.astype(jnp.float32),
                         loss_counts.astype(jnp.float32),
                         (loss_flags != 0).astype(jnp.float32)])          # (3, B, N)
    bins = fec_bins.astype(jnp.float32).reshape(-1)                       # (num_bounds,)

    out = pl.pallas_call(
        _offlearning_loss_kernel,
        out_shape=jax.ShapeDtypeStruct((1, 1), jnp.float32),
        in_specs=[
            pl.BlockSpec(memory_space=pltpu.MemorySpace.SMEM),   # fec_bins (scalars)
            pl.BlockSpec(memory_space=pltpu.MemorySpace.VMEM),   # (3, B) scalars slab
            pl.BlockSpec(memory_space=pltpu.MemorySpace.VMEM),   # fec_table
            pl.BlockSpec(memory_space=pltpu.MemorySpace.VMEM),   # (3, B, N) packets slab
        ],
        out_specs=pl.BlockSpec(memory_space=pltpu.MemorySpace.SMEM),
    )(bins, batch_scalars, fec_table.astype(jnp.float32), packets)
    return out[0, 0]


def _reference(pred, gcc, fec_table, frame, flags, counts, dg, bins):
    """Pure-JAX reference with the same per-element semantics."""
    diff = pred - gcc
    pos = jnp.maximum(diff, 0.0)
    neg = jnp.maximum(-diff, 0.0)
    bitrate_loss = jnp.mean(pos ** 2 * dg + neg ** 2 * (1.0 - dg))

    mask = flags != 0
    fs = frame.astype(jnp.float32)
    lc = counts.astype(jnp.float32)
    alr = lc / jnp.where(mask, fs, 1.0)
    bin_idx = jnp.sum(fs[..., None] >= bins[None, None, :], axis=-1)
    pf = jnp.take_along_axis(fec_table, bin_idx, axis=1)
    per = jnp.where(alr > pf, (alr - pf) * 3.0, pf - alr)
    per = jnp.where(mask, per, 0.0)
    cnt = jnp.sum(mask)
    fec_loss = jnp.sum(per) / jnp.maximum(cnt, 1).astype(jnp.float32)
    return bitrate_loss + fec_loss


if __name__ == "__main__":
    key = jax.random.PRNGKey(0)
    k1, k2, k3, k4, k5, k6, k7 = jax.random.split(key, 7)

    B, N = 4, 8
    # fec table boundaries (frame-size bucket edges), sorted ascending, deterministic
    fec_bins = jnp.array([5.0, 10.0, 20.0, 40.0, 80.0, 160.0, 320.0], dtype=jnp.float32)
    num_entries = fec_bins.shape[0] + 1            # fec_table covers all bucketize outputs

    pred_bitrate = jax.random.uniform(k1, (B,), minval=500.0, maxval=3000.0)
    gcc_bitrate = jax.random.uniform(k2, (B,), minval=500.0, maxval=3000.0)
    delay_gradient = jax.random.uniform(k3, (B,), minval=0.0, maxval=1.0)
    fec_table = jax.random.uniform(k4, (B, num_entries), minval=0.0, maxval=0.3)
    frame_samples = jax.random.randint(k5, (B, N), 1, 400).astype(jnp.int32)
    loss_flags = jax.random.bernoulli(k6, 0.5, (B, N)).astype(jnp.int32)
    loss_counts = jax.random.randint(k7, (B, N), 0, 50).astype(jnp.int32)

    result = offlearning_loss(pred_bitrate, gcc_bitrate, fec_table, frame_samples,
                              loss_flags, loss_counts, delay_gradient, fec_bins)
    result = jax.block_until_ready(result)

    ref = _reference(pred_bitrate, gcc_bitrate, fec_table, frame_samples,
                     loss_flags, loss_counts, delay_gradient, fec_bins)
    ref = jax.block_until_ready(ref)

    import numpy as np
    np.testing.assert_allclose(np.asarray(result), np.asarray(ref), rtol=1e-4, atol=1e-5)
    print("KERNEL_OK")
</pallas_src>

<mosaic_0001>
module attributes {stable_mosaic.version = 11 : i64} {
  func.func @_offlearning_loss_kernel(%arg0: memref<7xf32, #tpu.memory_space<smem>>, %arg1: memref<3x4xf32, #tpu.memory_space<vmem>>, %arg2: memref<4x8xf32, #tpu.memory_space<vmem>>, %arg3: memref<3x4x8xf32, #tpu.memory_space<vmem>>, %arg4: memref<1x1xf32, #tpu.memory_space<smem>>) attributes {dimension_semantics = [], scalar_prefetch = 0 : i64, scratch_operands = 0 : i64, tpu.core_type = #tpu.core_type<tc>} {
    %c0 = arith.constant 0 : index
    %c0_0 = arith.constant 0 : index
    %0 = vector.load %arg1[%c0, %c0_0] : memref<3x4xf32, #tpu.memory_space<vmem>>, vector<1x4xf32>
    %c1 = arith.constant 1 : index
    %c0_1 = arith.constant 0 : index
    %1 = vector.load %arg1[%c1, %c0_1] : memref<3x4xf32, #tpu.memory_space<vmem>>, vector<1x4xf32>
    %c2 = arith.constant 2 : index
    %c0_2 = arith.constant 0 : index
    %2 = vector.load %arg1[%c2, %c0_2] : memref<3x4xf32, #tpu.memory_space<vmem>>, vector<1x4xf32>
    %3 = arith.subf %0, %1 : vector<1x4xf32>
    %cst = arith.constant 0.000000e+00 : f32
    %4 = vector.broadcast %cst : f32 to vector<1x4xf32>
    %5 = arith.maximumf %3, %4 : vector<1x4xf32>
    %cst_3 = arith.constant 0.000000e+00 : f32
    %6 = vector.broadcast %cst_3 : f32 to vector<1x4xf32>
    %7 = arith.subf %6, %3 : vector<1x4xf32>
    %cst_4 = arith.constant 0.000000e+00 : f32
    %8 = vector.broadcast %cst_4 : f32 to vector<1x4xf32>
    %9 = arith.maximumf %7, %8 : vector<1x4xf32>
    %10 = arith.mulf %5, %5 : vector<1x4xf32>
    %11 = arith.mulf %10, %2 : vector<1x4xf32>
    %12 = arith.mulf %9, %9 : vector<1x4xf32>
    %cst_5 = arith.constant 1.000000e+00 : f32
    %13 = vector.broadcast %cst_5 : f32 to vector<1x4xf32>
    %14 = arith.subf %13, %2 : vector<1x4xf32>
    %15 = arith.mulf %12, %14 : vector<1x4xf32>
    %16 = arith.addf %11, %15 : vector<1x4xf32>
    %17 = vector.shape_cast %16 : vector<1x4xf32> to vector<1x1x4xf32>
    %cst_6 = arith.constant dense<0.000000e+00> : vector<1xf32>
    %18 = vector.multi_reduction <add>, %17, %cst_6 [1, 2] : vector<1x1x4xf32> to vector<1xf32>
    %19 = vector.shape_cast %18 : vector<1xf32> to vector<1x1x1xf32>
    %20 = vector.extract %19[0, 0, 0] : f32 from vector<1x1x1xf32>
    %cst_7 = arith.constant 2.500000e-01 : f32
    %21 = arith.mulf %20, %cst_7 : f32
    %c0_8 = arith.constant 0 : index
    %c0_9 = arith.constant 0 : index
    %c0_10 = arith.constant 0 : index
    %22 = vector.load %arg3[%c0_8, %c0_9, %c0_10] : memref<3x4x8xf32, #tpu.memory_space<vmem>>, vector<1x4x8xf32>
    %23 = vector.shape_cast %22 : vector<1x4x8xf32> to vector<4x8xf32>
    %c1_11 = arith.constant 1 : index
    %c0_12 = arith.constant 0 : index
    %c0_13 = arith.constant 0 : index
    %24 = vector.load %arg3[%c1_11, %c0_12, %c0_13] : memref<3x4x8xf32, #tpu.memory_space<vmem>>, vector<1x4x8xf32>
    %25 = vector.shape_cast %24 : vector<1x4x8xf32> to vector<4x8xf32>
    %c2_14 = arith.constant 2 : index
    %c0_15 = arith.constant 0 : index
    %c0_16 = arith.constant 0 : index
    %26 = vector.load %arg3[%c2_14, %c0_15, %c0_16] : memref<3x4x8xf32, #tpu.memory_space<vmem>>, vector<1x4x8xf32>
    %27 = vector.shape_cast %26 : vector<1x4x8xf32> to vector<4x8xf32>
    %cst_17 = arith.constant 0.000000e+00 : f32
    %28 = vector.broadcast %cst_17 : f32 to vector<4x8xf32>
    %29 = arith.cmpf ogt, %27, %28 : vector<4x8xf32>
    %cst_18 = arith.constant 1.000000e+00 : f32
    %30 = vector.broadcast %cst_18 : f32 to vector<4x8xf32>
    %31 = arith.select %29, %23, %30 : vector<4x8xi1>, vector<4x8xf32>
    %32 = arith.divf %25, %31 : vector<4x8xf32>
    %c0_19 = arith.constant 0 : index
    %c0_20 = arith.constant 0 : index
    %33 = vector.load %arg2[%c0_19, %c0_20] : memref<4x8xf32, #tpu.memory_space<vmem>>, vector<4x1xf32>
    %34 = vector.shape_cast %33 : vector<4x1xf32> to vector<4x1xf32>
    %35 = vector.broadcast %34 : vector<4x1xf32> to vector<4x8xf32>
    %c0_21 = arith.constant 0 : index
    %36 = memref.load %arg0[%c0_21] : memref<7xf32, #tpu.memory_space<smem>>
    %37 = vector.broadcast %36 : f32 to vector<4x8xf32>
    %38 = arith.cmpf oge, %23, %37 : vector<4x8xf32>
    %c0_22 = arith.constant 0 : index
    %c1_23 = arith.constant 1 : index
    %39 = vector.load %arg2[%c0_22, %c1_23] : memref<4x8xf32, #tpu.memory_space<vmem>>, vector<4x1xf32>
    %40 = vector.shape_cast %39 : vector<4x1xf32> to vector<4x1xf32>
    %41 = vector.broadcast %40 : vector<4x1xf32> to vector<4x8xf32>
    %42 = arith.select %38, %41, %35 : vector<4x8xi1>, vector<4x8xf32>
    %c1_24 = arith.constant 1 : index
    %43 = memref.load %arg0[%c1_24] : memref<7xf32, #tpu.memory_space<smem>>
    %44 = vector.broadcast %43 : f32 to vector<4x8xf32>
    %45 = arith.cmpf oge, %23, %44 : vector<4x8xf32>
    %c0_25 = arith.constant 0 : index
    %c2_26 = arith.constant 2 : index
    %46 = vector.load %arg2[%c0_25, %c2_26] : memref<4x8xf32, #tpu.memory_space<vmem>>, vector<4x1xf32>
    %47 = vector.shape_cast %46 : vector<4x1xf32> to vector<4x1xf32>
    %48 = vector.broadcast %47 : vector<4x1xf32> to vector<4x8xf32>
    %49 = arith.select %45, %48, %42 : vector<4x8xi1>, vector<4x8xf32>
    %c2_27 = arith.constant 2 : index
    %50 = memref.load %arg0[%c2_27] : memref<7xf32, #tpu.memory_space<smem>>
    %51 = vector.broadcast %50 : f32 to vector<4x8xf32>
    %52 = arith.cmpf oge, %23, %51 : vector<4x8xf32>
    %c0_28 = arith.constant 0 : index
    %c3 = arith.constant 3 : index
    %53 = vector.load %arg2[%c0_28, %c3] : memref<4x8xf32, #tpu.memory_space<vmem>>, vector<4x1xf32>
    %54 = vector.shape_cast %53 : vector<4x1xf32> to vector<4x1xf32>
    %55 = vector.broadcast %54 : vector<4x1xf32> to vector<4x8xf32>
    %56 = arith.select %52, %55, %49 : vector<4x8xi1>, vector<4x8xf32>
    %c3_29 = arith.constant 3 : index
    %57 = memref.load %arg0[%c3_29] : memref<7xf32, #tpu.memory_space<smem>>
    %58 = vector.broadcast %57 : f32 to vector<4x8xf32>
    %59 = arith.cmpf oge, %23, %58 : vector<4x8xf32>
    %c0_30 = arith.constant 0 : index
    %c4 = arith.constant 4 : index
    %60 = vector.load %arg2[%c0_30, %c4] : memref<4x8xf32, #tpu.memory_space<vmem>>, vector<4x1xf32>
    %61 = vector.shape_cast %60 : vector<4x1xf32> to vector<4x1xf32>
    %62 = vector.broadcast %61 : vector<4x1xf32> to vector<4x8xf32>
    %63 = arith.select %59, %62, %56 : vector<4x8xi1>, vector<4x8xf32>
    %c4_31 = arith.constant 4 : index
    %64 = memref.load %arg0[%c4_31] : memref<7xf32, #tpu.memory_space<smem>>
    %65 = vector.broadcast %64 : f32 to vector<4x8xf32>
    %66 = arith.cmpf oge, %23, %65 : vector<4x8xf32>
    %c0_32 = arith.constant 0 : index
    %c5 = arith.constant 5 : index
    %67 = vector.load %arg2[%c0_32, %c5] : memref<4x8xf32, #tpu.memory_space<vmem>>, vector<4x1xf32>
    %68 = vector.shape_cast %67 : vector<4x1xf32> to vector<4x1xf32>
    %69 = vector.broadcast %68 : vector<4x1xf32> to vector<4x8xf32>
    %70 = arith.select %66, %69, %63 : vector<4x8xi1>, vector<4x8xf32>
    %c5_33 = arith.constant 5 : index
    %71 = memref.load %arg0[%c5_33] : memref<7xf32, #tpu.memory_space<smem>>
    %72 = vector.broadcast %71 : f32 to vector<4x8xf32>
    %73 = arith.cmpf oge, %23, %72 : vector<4x8xf32>
    %c0_34 = arith.constant 0 : index
    %c6 = arith.constant 6 : index
    %74 = vector.load %arg2[%c0_34, %c6] : memref<4x8xf32, #tpu.memory_space<vmem>>, vector<4x1xf32>
    %75 = vector.shape_cast %74 : vector<4x1xf32> to vector<4x1xf32>
    %76 = vector.broadcast %75 : vector<4x1xf32> to vector<4x8xf32>
    %77 = arith.select %73, %76, %70 : vector<4x8xi1>, vector<4x8xf32>
    %c6_35 = arith.constant 6 : index
    %78 = memref.load %arg0[%c6_35] : memref<7xf32, #tpu.memory_space<smem>>
    %79 = vector.broadcast %78 : f32 to vector<4x8xf32>
    %80 = arith.cmpf oge, %23, %79 : vector<4x8xf32>
    %c0_36 = arith.constant 0 : index
    %c7 = arith.constant 7 : index
    %81 = vector.load %arg2[%c0_36, %c7] : memref<4x8xf32, #tpu.memory_space<vmem>>, vector<4x1xf32>
    %82 = vector.shape_cast %81 : vector<4x1xf32> to vector<4x1xf32>
    %83 = vector.broadcast %82 : vector<4x1xf32> to vector<4x8xf32>
    %84 = arith.select %80, %83, %77 : vector<4x8xi1>, vector<4x8xf32>
    %85 = arith.subf %32, %84 : vector<4x8xf32>
    %cst_37 = arith.constant 0.000000e+00 : f32
    %86 = vector.broadcast %cst_37 : f32 to vector<4x8xf32>
    %87 = arith.cmpf ogt, %85, %86 : vector<4x8xf32>
    %cst_38 = arith.constant 3.000000e+00 : f32
    %88 = vector.broadcast %cst_38 : f32 to vector<4x8xf32>
    %89 = arith.mulf %88, %85 : vector<4x8xf32>
    %cst_39 = arith.constant 0.000000e+00 : f32
    %90 = vector.broadcast %cst_39 : f32 to vector<4x8xf32>
    %91 = arith.subf %90, %85 : vector<4x8xf32>
    %92 = arith.select %87, %89, %91 : vector<4x8xi1>, vector<4x8xf32>
    %93 = arith.mulf %92, %27 : vector<4x8xf32>
    %94 = tpu.concatenate %93, %27 in 0 : vector<4x8xf32>, vector<4x8xf32> -> vector<8x8xf32>
    %cst_40 = arith.constant dense<0.000000e+00> : vector<8xf32>
    %95 = vector.multi_reduction <add>, %94, %cst_40 [1] : vector<8x8xf32> to vector<8xf32>
    %96 = vector.shape_cast %95 : vector<8xf32> to vector<8x1xf32>
    %97 = vector.extract_strided_slice %96 {offsets = [0, 0], sizes = [4, 1], strides = [1, 1]} : vector<8x1xf32> to vector<4x1xf32>
    %98 = vector.shape_cast %97 : vector<4x1xf32> to vector<1x4x1xf32>
    %cst_41 = arith.constant dense<0.000000e+00> : vector<1xf32>
    %99 = vector.multi_reduction <add>, %98, %cst_41 [1, 2] : vector<1x4x1xf32> to vector<1xf32>
    %100 = vector.shape_cast %99 : vector<1xf32> to vector<1x1x1xf32>
    %101 = vector.extract %100[0, 0, 0] : f32 from vector<1x1x1xf32>
    %102 = vector.extract_strided_slice %96 {offsets = [4, 0], sizes = [4, 1], strides = [1, 1]} : vector<8x1xf32> to vector<4x1xf32>
    %103 = vector.shape_cast %102 : vector<4x1xf32> to vector<1x4x1xf32>
    %cst_42 = arith.constant dense<0.000000e+00> : vector<1xf32>
    %104 = vector.multi_reduction <add>, %103, %cst_42 [1, 2] : vector<1x4x1xf32> to vector<1xf32>
    %105 = vector.shape_cast %104 : vector<1xf32> to vector<1x1x1xf32>
    %106 = vector.extract %105[0, 0, 0] : f32 from vector<1x1x1xf32>
    %cst_43 = arith.constant 1.000000e+00 : f32
    %107 = arith.maximumf %106, %cst_43 : f32
    %108 = arith.divf %101, %107 : f32
    %109 = arith.addf %21, %108 : f32
    %c0_44 = arith.constant 0 : index
    %c0_45 = arith.constant 0 : index
    %110 = memref.load %arg4[%c0_44, %c0_45] : memref<1x1xf32, #tpu.memory_space<smem>>
    memref.store %109, %arg4[%c0_44, %c0_45] : memref<1x1xf32, #tpu.memory_space<smem>>
    return
  }
}

</mosaic_0001>

<bundles_post_ra>
// kernel: tpu_custom_call.1
= control target key start
LH: loop header
LB: loop body
LE: loop exit
PB: predicated region body
PF: predicated region fallthrough
CT: control target
= control target key end

     0   :  { %9 = vsyncpa [#allocation4], 0  ;;  %s419_s0 = inlined_call_operand.hbm [shape: f32[7], index: 0, kind: input, shape index: {}]   ;;  %s420_s1 = inlined_call_operand.hbm [shape: f32[3,4], index: 1, kind: input, shape index: {}]   ;;  %s421_s2 = inlined_call_operand.vmem [shape: f32[4,8], index: 2, kind: input, shape index: {}]   ;;  %s422_s3 = inlined_call_operand.hbm [shape: f32[3,4,8], index: 3, kind: input, shape index: {}]   ;;  %s423_s4 = inlined_call_operand.hbm [shape: f32[1,1], index: 4, kind: output, shape index: {}]  }
   0x1   :  { %10 = vsyncpa [#allocation3], 0 }
   0x2   :  { %11 = vsyncpa [#allocation8], 0 }
   0x3   :  { %12 = vsyncpa [#allocation5], 0  ;;  %s256_s17 = scalar_lea.hbm %s419_s0, 16 }
   0x4   :  { %p257_p0 = scmp.ne.s32.totalorder %s419_s0, %s256_s17  ;;  %p260_p1 = scmp.lt.u32.totalorder %s256_s17, %s419_s0 }
   0x6   :  { %p262_p2 = pnand %p260_p1, %p257_p0 }
   0x8   :  { %265 = shalt.err (!%p262_p2)
}
   0x9   :  { %s328_s22 = smov [#allocation2]   ;;  %s329_s25 = smov [#allocation6]  }
   0xa   :  { %20 = dma.hbm_to_smem %s419_s0, 16, %s328_s22, [#allocation4]  }
   0xb   :  { %s27_s26 = sshll.u32 %s329_s25, 4  ;;  %s330_s27 = smov [#allocation7]   ;;  %s28_s26 = int_to_ptr.vmem [resolvable:$true] %s27_s26 }
   0xc   :  { %s38_s28 = sshll.u32 %s330_s27, 4  ;;  %s266_s5 = scalar_lea.hbm %s420_s1, 64  ;;  %s39_s28 = int_to_ptr.vmem [resolvable:$true] %s38_s28 }
   0xd   :  { %p267_p3 = scmp.ne.s32.totalorder %s420_s1, %s266_s5  ;;  %p270_p4 = scmp.lt.u32.totalorder %s266_s5, %s420_s1 }
   0xf   :  { %p272_p5 = pnand %p270_p4, %p267_p3 }
  0x11   :  { %275 = shalt.err (!%p272_p5)
}
  0x12   :  { %s276_s0 = scalar_lea.vmem %s28_s26, 64  ;;  %p281_p7 = scmp.lt.s32.totalorder %s28_s26, %s28_s26 }
  0x13   :  { %p277_p6 = scmp.ne.s32.totalorder %s28_s26, %s276_s0  ;;  %p282_p8 = scmp.lt.s32.totalorder %s276_s0, %s276_s0 }
  0x15   :  { %p283_p9 = por %p282_p8, %p281_p7 }
  0x17   :  { %p284_p10 = pnand %p283_p9, %p277_p6 }
  0x19   :  { %287 = shalt.err (!%p284_p10)
}
  0x1a   :  { %30 = dma.hbm_to_vmem [thread:$0]  %s420_s1, 64, %s28_s26, [#allocation3]  }
  0x1b   :  { %s288_s14 = scalar_lea.hbm %s422_s3, 192 }
  0x1c   :  { %p289_p11 = scmp.ne.s32.totalorder %s422_s3, %s288_s14  ;;  %p292_p12 = scmp.lt.u32.totalorder %s288_s14, %s422_s3 }
  0x1e   :  { %p294_p13 = pnand %p292_p12, %p289_p11 }
  0x20   :  { %297 = shalt.err (!%p294_p13)
}
  0x21   :  { %s298_s19 = scalar_lea.vmem %s39_s28, 192  ;;  %p303_p1 = scmp.lt.s32.totalorder %s39_s28, %s39_s28 }
  0x22   :  { %p299_p0 = scmp.ne.s32.totalorder %s39_s28, %s298_s19  ;;  %p304_p2 = scmp.lt.s32.totalorder %s298_s19, %s298_s19 }
  0x24   :  { %p305_p3 = por %p304_p2, %p303_p1 }
  0x26   :  { %p306_p4 = pnand %p305_p3, %p299_p0 }
  0x28   :  { %309 = shalt.err (!%p306_p4)
}
  0x29   :  { %s331_s1 = smov 64   ;;  %s332_s20 = smov 4  }
  0x2a   :  { %44 = dma.hbm_to_vmem [thread:$0]  %s422_s3, 192, %s39_s28, [#allocation8], %s331_s1, %s331_s1, %s332_s20  }
  0x2b   :  { %320 = dma.done.wait [#allocation4], 16  }
  0x2c   :  { %321 = vsyncadd [#allocation4], 4294967280 }
  0x2d   :  { %322 = dma.done.wait [#allocation3], 64  }
  0x2e   :  { %323 = vsyncadd [#allocation3], 4294967232 }
  0x2f   :  { %324 = dma.done.wait [#allocation8], 192  }
  0x30   :  { %325 = vsyncadd [#allocation8], 4294967104 }
  0x31   :  { %54 = sfence }
  0x32   :  { %v89_v0 = vld [vmem:[%s421_s2] sm:$0xf]  ;;  %v333_v1 = vmov 2   ;;  %v334_v2 = vmov 0   ;;  %v335_v3 = vmov 3   ;;  %v336_v4 = vmov 1  }
  0x33   :  { %245 = vset.pattern.permute.xlu1 %v333_v1  ;;  %243 = vset.pattern.permute.xlu0 %v334_v2  ;;  %v337_v5 = vmov 4   ;;  %v338_v6 = vmov 5   ;;  %v339_v7 = vmov 6   ;;  %v340_v8 = vmov 7   ;;  %s95_s2 = sld [smem:[#allocation2]]  ;;  %s214_s3 = sld [smem:[#allocation2 + $0x1]] }
  0x34   :  { %107 = vperm.xlu1 %245, %v89_v0   ;;  %92 = vperm.xlu0 %243, %v89_v0   ;;  %v84_v9 = vld [vmem:[#allocation7 + $0x8] sm:$0xf]  ;;  %v80_v12 = vld [vmem:[#allocation7] sm:$0xf]  ;;  %s215_s25 = sld [smem:[#allocation2 + $0x2]]  ;;  %s216_s26 = sld [smem:[#allocation2 + $0x3]] }
  0x35   :  { %vm85_vm0 = vcmp.gt.f32.partialorder %v84_v9, 0.0  ;;  %s217_s27 = sld [smem:[#allocation2 + $0x4]]  ;;  %s218_s28 = sld [smem:[#allocation2 + $0x5]]  ;;  %v82_v29 = vld [vmem:[#allocation7 + $0x4] sm:$0xf]  ;;  %v158_v40 = vrot.slane %v84_v9, 4 }
  0x36   :  { %v86_v13 = vsel %vm85_vm0, %v80_v12, 1.0  ;;  %s219_s29 = sld [smem:[#allocation2 + $0x6]]  ;;  %vm160_vm9 = vcmask 1043456   ;;  %vm162_vm10 = vcmask 64512   ;;  %v55_v45 = vld [vmem:[#allocation6] sm:$0x1] }
  0x37   :  { %252 = vrcp.f32 %v86_v13  ;;  %v56_v46 = vld [vmem:[#allocation6 + $0x1] sm:$0x1]  ;;  %v57_v51 = vld [vmem:[#allocation6 + $0x2] sm:$0x1]  ;;  %vm68_vm11 = vcmask 24576   ;;  %vm166_vm12 = vcmask 3072  }
  0x38   :  { %246 = vset.pattern.permute.xlu1 %v335_v3  ;;  %244 = vset.pattern.permute.xlu0 %v336_v4  ;;  %v58_v47 = vsub.f32 %v55_v45, %v56_v46  ;;  %v65_v54 = vsub.f32 1.0, %v57_v51  ;;  %s341_s7 = smov 1.0   ;;  %s310_s14 = scalar_lea.hbm %s423_s4, 16 }
  0x39   :  { %115 = vperm.xlu1 %246, %v89_v0   ;;  %99 = vperm.xlu0 %244, %v89_v0   ;;  %v96_v14 = vstv %s95_s2  ;;  %v104_v16 = vstv %s214_s3  ;;  %p311_p5 = scmp.ne.s32.totalorder %s423_s4, %s310_s14  ;;  %p314_p6 = scmp.lt.u32.totalorder %s310_s14, %s423_s4 }
  0x3a   :  { %vm97_vm1 = vcmp.ge.f32.partialorder %v80_v12, %v96_v14  ;;  %vm105_vm2 = vcmp.ge.f32.partialorder %v80_v12, %v104_v16  ;;  %v112_v19 = vstv %s215_s25  ;;  %v120_v20 = vstv %s216_s26 }
  0x3b   :  { %vm113_vm3 = vcmp.ge.f32.partialorder %v80_v12, %v112_v19  ;;  %vm121_vm4 = vcmp.ge.f32.partialorder %v80_v12, %v120_v20  ;;  %v128_v23 = vstv %s217_s27  ;;  %v136_v24 = vstv %s218_s28  ;;  %p316_p7 = pnand %p314_p6, %p311_p5 }
  0x3c   :  { %v144_v28 = vstv %s219_s29  ;;  %vm129_vm5 = vcmp.ge.f32.partialorder %v80_v12, %v128_v23  ;;  %vm137_vm6 = vcmp.ge.f32.partialorder %v80_v12, %v136_v24  ;;  %v60_v48 = vsub.f32 0.0, %v58_v47 }
  0x3d   :  { %247 = vset.pattern.permute.xlu1 %v337_v5  ;;  %248 = vset.pattern.permute.xlu0 %v338_v6  ;;  %vm145_vm7 = vcmp.ge.f32.partialorder %v80_v12, %v144_v28  ;;  %v59_v49 = vmax.f32 %v58_v47, 0.0 }
  0x3e   :  { %123 = vperm.xlu1 %247, %v89_v0   ;;  %131 = vperm.xlu0 %248, %v89_v0   ;;  %v61_v50 = vmax.f32 %v60_v48, 0.0 }
  0x3f   :  { %v62_v52 = vmul.f32 %v59_v49, %v59_v49 }
  0x40   :  { %v64_v53 = vmul.f32 %v61_v50, %v61_v50 }
  0x41   :  { %v253_v25 = vpop.eup %252  ;;  %v63_v55 = vmul.f32 %v62_v52, %v57_v51 }
  0x42   :  { %249 = vset.pattern.permute.xlu1 %v339_v7  ;;  %251 = vset.pattern.permute.xlu0 %v340_v8  ;;  %v88_v32 = vmul.f32 %v253_v25, %v82_v29  ;;  %v66_v56 = vmul.f32 %v65_v54, %v64_v53 }
  0x43   :  { %139 = vperm.xlu1 %249, %v89_v0  }
  0x44   :  { %v67_v57 = vadd.f32 %v66_v56, %v63_v55 }
  0x46   :  { %v69_v58 = vsel %vm68_vm11, %v67_v57, 0.0 }
  0x47   :  { %250 = vset.pattern.permute.xlu1 %v340_v8 }
  0x48   :  { %147 = vperm.xlu1 %250, %v89_v0  }
  0x6c   :  { %70 = vadd.xlane.f32.xlu1 %v69_v58 }
  0xb3   :  { %v108_v10 = vpop.permute.xlu1 %107  ;;  %v93_v11 = vpop.permute.xlu0 %92 }
  0xb8   :  { %v116_v15 = vpop.permute.xlu1 %115  ;;  %v100_v17 = vpop.permute.xlu0 %99 }
  0xb9   :  { %v102_v18 = vsel %vm97_vm1, %v100_v17, %v93_v11 }
  0xba   :  { %v110_v22 = vsel %vm105_vm2, %v108_v10, %v102_v18 }
  0xbb   :  { %v118_v26 = vsel %vm113_vm3, %v116_v15, %v110_v22 }
  0xbd   :  { %v124_v21 = vpop.permute.xlu1 %123  ;;  %v132_v31 = vpop.permute.xlu0 %131 }
  0xbe   :  { %v126_v30 = vsel %vm121_vm4, %v124_v21, %v118_v26 }
  0xbf   :  { %v134_v33 = vsel %vm129_vm5, %v132_v31, %v126_v30 }
  0xc2   :  { %v140_v27 = vpop.permute.xlu1 %139 }
  0xc3   :  { %v142_v34 = vsel %vm137_vm6, %v140_v27, %v134_v33 }
  0xc7   :  { %v148_v35 = vpop.permute.xlu1 %147 }
  0xc8   :  { %v150_v36 = vsel %vm145_vm7, %v148_v35, %v142_v34 }
  0xc9   :  { %v151_v37 = vsub.f32 %v88_v32, %v150_v36 }
  0xcb   :  { %vm152_vm8 = vcmp.gt.f32.partialorder %v151_v37, 0.0  ;;  %v153_v38 = vmul.f32 3.0, %v151_v37  ;;  %v154_v39 = vsub.f32 0.0, %v151_v37 }
  0xcd   :  { %v155_v41 = vsel %vm152_vm8, %v153_v38, %v154_v39 }
  0xce   :  { %v156_v42 = vmul.f32 %v155_v41, %v84_v9 }
  0xd0   :  { %v161_v43 = vsel %vm160_vm9, %v156_v42, %v158_v40 }
  0xd1   :  { %v163_v44 = vsel %vm162_vm10, %v161_v43, 0.0 }
  0xd2   :  { %164 = vadd.xlane.f32.xlu0 %v163_v44 }
  0xf9   :  { %v71_v63 = vpop.xlane.xlu1 %70 }
  0xfa   :  { %v72_v0 = vrot.slane %v71_v63, 4 }
  0xfc   :  { %v73_v1 = vadd.f32 %v72_v0, %v71_v63 }
  0xfe   :  { %v74_v2 = vrot.slane %v73_v1, 2 }
 0x100   :  { %v75_v3 = vadd.f32 %v74_v2, %v73_v1 }
 0x102   :  { %v76_v4 = vrot.slane %v75_v3, 1 }
 0x104   :  { %v77_v5 = vadd.f32 %v76_v4, %v75_v3 }
 0x106   :  { %220 = vpush %v77_v5 }
 0x137   :  { %s221_s30 = spop %220 }
 0x138   :  { %s79_s9 = smul.f32 0.25, %s221_s30 }
 0x15f   :  { %v165_v59 = vpop.xlane.xlu0 %164 }
 0x160   :  { %v178_v60 = vrot.slane %v165_v59, 4  ;;  %v167_v61 = vsel %vm166_vm12, %v165_v59, 0.0 }
 0x161   :  { %168 = vadd.xlane.f32.xlu0 %v167_v61 }
 0x162   :  { %v180_v62 = vsel %vm166_vm12, %v178_v60, 0.0 }
 0x165   :  { %181 = vadd.xlane.f32.xlu0 %v180_v62 }
 0x1ee   :  { %v169_v6 = vpop.xlane.xlu0 %168 }
 0x1ef   :  { %v170_v7 = vrot.slane %v169_v6, 4 }
 0x1f1   :  { %v171_v8 = vadd.f32 %v170_v7, %v169_v6 }
 0x1f2   :  { %v182_v9 = vpop.xlane.xlu0 %181 }
 0x1f3   :  { %v172_v10 = vrot.slane %v171_v8, 2  ;;  %v183_v11 = vrot.slane %v182_v9, 4 }
 0x1f5   :  { %v184_v12 = vadd.f32 %v183_v11, %v182_v9  ;;  %v173_v13 = vadd.f32 %v172_v10, %v171_v8 }
 0x1f7   :  { %v185_v14 = vrot.slane %v184_v12, 2  ;;  %v174_v15 = vrot.slane %v173_v13, 1 }
 0x1f9   :  { %v186_v16 = vadd.f32 %v185_v14, %v184_v12  ;;  %v175_v17 = vadd.f32 %v174_v15, %v173_v13 }
 0x1fb   :  { %222 = vpush %v175_v17  ;;  %v187_v18 = vrot.slane %v186_v16, 1 }
 0x1fd   :  { %v188_v19 = vadd.f32 %v187_v18, %v186_v16 }
 0x1ff   :  { %224 = vpush %v188_v19 }
 0x22c   :  { %s223_s5 = spop %222 }
 0x230   :  { %s225_s6 = spop %224 }
 0x231   :  { %s190_s8 = smax.f32 %s341_s7, %s225_s6 }
 0x232   :  { %v191_v20 = vstv %s190_s8 }
 0x233   :  { %254 = vrcp.f32 %v191_v20 }
 0x23d   :  { %v255_v21 = vpop.eup %254 }
 0x23e   :  { %226 = vpush %v255_v21 }
 0x26f   :  { %s227_s0 = spop %226 }
 0x270   :  { %s194_s10 = smul.f32 %s227_s0, %s223_s5 }
 0x272   :  { %s195_s11 = sadd.f32 %s194_s10, %s79_s9 }
 0x274   :  { %197 = sst [smem:[#allocation9]] %s195_s11 }
 0x275   :  { %319 = shalt.err (!%p316_p7)
}
 0x276   :  { %s342_s19 = smov [#allocation9]  }
 0x277   :  { %205 = dma.smem_to_hbm %s342_s19, 16, %s423_s4, [#allocation5]  }
 0x278   :  { %326 = dma.done.wait [#allocation5], 16  }
 0x279   :  { %327 = vsyncadd [#allocation5], 4294967280 }
 0x27a   :  { %209 = sfence }
 0x27b   :  { %210 = vsyncpa [#allocation3], 1 }
 0x27c   :  { %211 = vsyncpa [#allocation8], 1 }
 0x27d   :  { %212 = vsyncpa [#allocation4], 1 }
 0x27e   :  { %213 = vsyncpa [#allocation5], 1 }

</bundles_post_ra>
